<compile_context>
chip_gen: v7x
topology: tpu7x:2x2x1
jax: 0.10.0
libtpu: 0.0.40
codegen_flags: <defaults>
</compile_context>

<pallas_src>
import functools

import jax
import jax.numpy as jnp
from jax import lax
from jax.experimental import pallas as pl
from jax.experimental.pallas import tpu as pltpu


def _round_up(x, m):
    return (x + m - 1) // m * m


def _largest_divisor_tile(padded, align, cap):
    """Largest multiple of `align` that divides `padded` and is <= cap."""
    best = align
    t = align
    while t <= min(cap, padded):
        if padded % t == 0:
            best = t
        t += align
    return best


def _block_spec(shape, index_map, depth=None):
    """BlockSpec with optional deeper pipelining (falls back gracefully)."""
    if depth is not None and hasattr(pl, "Buffered"):
        try:
            return pl.BlockSpec(shape, index_map, pipeline_mode=pl.Buffered(depth))
        except TypeError:  # older JAX without pipeline_mode kwarg
            pass
    return pl.BlockSpec(shape, index_map)


# --------------------------------------------------------------------------
# Generic tiled matmul + bias (+ optional ReLU) Pallas kernels.
# bf16 inputs, f32 accumulation.  Used for: backbone conv (patch-matmul),
# RCNN FC and the fused RCNN reg|cls head.
# --------------------------------------------------------------------------
def _mm_kernel_scratch(x_ref, w_ref, b_ref, o_ref, acc_ref, *, relu):
    """Non-f32 output: accumulate in a f32 VMEM scratch, cast at the end."""
    k = pl.program_id(2)

    @pl.when(k == 0)
    def _():
        acc_ref[...] = jnp.zeros_like(acc_ref)

    acc_ref[...] += jnp.dot(x_ref[...], w_ref[...],
                            preferred_element_type=jnp.float32)

    @pl.when(k == pl.num_programs(2) - 1)
    def _():
        out = acc_ref[...] + b_ref[...]
        if relu:
            out = jnp.maximum(out, 0.0)
        o_ref[...] = out.astype(o_ref.dtype)


def _mm_kernel_inplace(x_ref, w_ref, b_ref, o_ref, *, relu):
    """f32 output: accumulate directly into the resident output block."""
    k = pl.program_id(2)

    @pl.when(k == 0)
    def _():
        o_ref[...] = jnp.broadcast_to(b_ref[...], o_ref.shape)

    o_ref[...] += jnp.dot(x_ref[...], w_ref[...],
                          preferred_element_type=jnp.float32)

    if relu:
        @pl.when(k == pl.num_programs(2) - 1)
        def _():
            o_ref[...] = jnp.maximum(o_ref[...], 0.0)


def _prep(a, rows, cols, dtype):
    """Cast (and zero-pad only if needed) a 2D operand."""
    a = a.astype(dtype)
    r, c = a.shape
    if (r, c) != (rows, cols):
        a = jnp.pad(a, ((0, rows - r), (0, cols - c)))
    return a


def matmul_bias(x, w, b, relu=False, out_dtype=jnp.float32):
    """out = relu?(x @ w + b).  Callers always receive the [:M, :N] slice."""
    M, K = x.shape
    K2, N = w.shape
    assert K == K2

    # M / N tiles: full (padded) extent when small, capped blocks when large.
    if M >= 512:
        Mp = _round_up(M, 256)
        tm = 512 if Mp % 512 == 0 else 256
    elif M >= 256:
        Mp = _round_up(M, 256)
        tm = 256
    else:
        Mp = _round_up(M, 16)
        tm = Mp
    if N >= 512:
        Np = _round_up(N, 256)
        tn = 512 if Np % 512 == 0 else 256
    elif N >= 256:
        Np = _round_up(N, 256)
        tn = 256
    else:
        Np = _round_up(N, 128)
        tn = Np
    # K tile: largest multiple of 128 dividing padded K (avoids K padding for
    # e.g. K = 49*C = 6272 -> tk = 896).
    Kp = _round_up(K, 128)
    tk = _largest_divisor_tile(Kp, 128, 1024)
    nsteps = Kp // tk
    depth = 3 if nsteps >= 3 else None  # deeper pipelining on deep-K matmuls

    xp = _prep(x, Mp, Kp, jnp.bfloat16)
    wp = _prep(w, Kp, Np, jnp.bfloat16)
    bp = _prep(b.reshape(1, -1), 1, Np, jnp.float32)

    use_scratch = jnp.dtype(out_dtype) != jnp.dtype(jnp.float32)
    if use_scratch:
        kernel = functools.partial(_mm_kernel_scratch, relu=relu)
        scratch = [pltpu.VMEM((tm, tn), jnp.float32)]
    else:
        kernel = functools.partial(_mm_kernel_inplace, relu=relu)
        scratch = []

    out = pl.pallas_call(
        kernel,
        out_shape=jax.ShapeDtypeStruct((Mp, Np), out_dtype),
        grid_spec=pltpu.PrefetchScalarGridSpec(
            num_scalar_prefetch=0,
            grid=(Mp // tm, Np // tn, nsteps),
            in_specs=[
                _block_spec((tm, tk), lambda i, j, k: (i, k), depth),
                _block_spec((tk, tn), lambda i, j, k: (k, j), depth),
                pl.BlockSpec((1, tn), lambda i, j, k: (0, j)),
            ],
            out_specs=pl.BlockSpec((tm, tn), lambda i, j, k: (i, j)),
            scratch_shapes=scratch,
        ),
        compiler_params=pltpu.CompilerParams(
            dimension_semantics=("parallel", "parallel", "arbitrary")),
    )(xp, wp, bp)
    return out[:M, :N]


# --------------------------------------------------------------------------
# Fused RPN: 3x3 conv + ReLU + (reg | cls) 1x1 heads in a single Pallas
# kernel.  The padded NHWC feature map of one image stays resident in VMEM;
# the 9 conv taps are in-kernel shifted views accumulated into one f32 value,
# so no im2col is ever materialized in HBM.  The tiny head is accumulated into
# the resident (Hf*Wf, 128) output block across conv-output-channel blocks j,
# so rpn_hidden never touches HBM either.
# --------------------------------------------------------------------------
def _rpn_fused_kernel(fm_ref, wconv_ref, bconv_ref, whead_ref, bhead_ref,
                      o_ref, *, Hf, Wf):
    j = pl.program_id(1)
    C = fm_ref.shape[-1]
    fm = fm_ref[...]                               # (Hf+2, Wf+2, C), one load
    acc = None
    t = 0
    for dy in range(3):
        for dx in range(3):
            x_tap = fm[dy:dy + Hf, dx:dx + Wf, :].reshape(Hf * Wf, C)
            contrib = jnp.dot(x_tap, wconv_ref[t],
                              preferred_element_type=jnp.float32)
            acc = contrib if acc is None else acc + contrib
            t += 1
    hidden = jnp.maximum(acc + bconv_ref[...], 0.0).astype(jnp.bfloat16)
    head = jnp.dot(hidden, whead_ref[...], preferred_element_type=jnp.float32)

    @pl.when(j == 0)
    def _():
        o_ref[...] = jnp.broadcast_to(bhead_ref[...], o_ref.shape)

    o_ref[...] += head


def rpn_conv_heads(feature_maps_nhwc, wconv, bconv, whead, bhead, cj_cap=256):
    """feature_maps_nhwc: (N, Hf, Wf, C); wconv: (9, C, Cout);
    whead: (Cout, 5*num_anchors).  Returns (N, Hf*Wf, 128-padded head dims)."""
    N, Hf, Wf, C = feature_maps_nhwc.shape
    Cout = wconv.shape[-1]
    Hn = _round_up(whead.shape[1], 128)
    Cout_p = _round_up(Cout, 128)
    cj = _largest_divisor_tile(Cout_p, 128, cj_cap)
    n_j = Cout_p // cj

    fpad = jnp.pad(feature_maps_nhwc.astype(jnp.bfloat16),
                   ((0, 0), (1, 1), (1, 1), (0, 0)))
    wconv_p = jnp.pad(wconv.astype(jnp.bfloat16),
                      ((0, 0), (0, 0), (0, Cout_p - Cout)))
    bconv_p = jnp.pad(bconv.reshape(1, -1).astype(jnp.float32),
                      ((0, 0), (0, Cout_p - Cout)))
    whead_p = jnp.pad(whead.astype(jnp.bfloat16),
                      ((0, Cout_p - Cout), (0, Hn - whead.shape[1])))
    bhead_p = jnp.pad(bhead.reshape(1, -1).astype(jnp.float32),
                      ((0, 0), (0, Hn - bhead.shape[0])))

    Mrows = Hf * Wf
    out = pl.pallas_call(
        functools.partial(_rpn_fused_kernel, Hf=Hf, Wf=Wf),
        out_shape=jax.ShapeDtypeStruct((N, Mrows, Hn), jnp.float32),
        grid_spec=pltpu.PrefetchScalarGridSpec(
            num_scalar_prefetch=0,
            grid=(N, n_j),
            in_specs=[
                # padded fm slab: index depends only on n -> DMA'd once per
                # image and reused across all j iterations.
                pl.BlockSpec((None, Hf + 2, Wf + 2, C),
                             lambda n, j: (n, 0, 0, 0)),
                pl.BlockSpec((9, C, cj), lambda n, j: (0, 0, j)),
                pl.BlockSpec((1, cj), lambda n, j: (0, j)),
                pl.BlockSpec((cj, Hn), lambda n, j: (j, 0)),
                pl.BlockSpec((1, Hn), lambda n, j: (0, 0)),
            ],
            out_specs=pl.BlockSpec((None, Mrows, Hn), lambda n, j: (n, 0, 0)),
        ),
        compiler_params=pltpu.CompilerParams(
            dimension_semantics=("parallel", "arbitrary")),
    )(fpad, wconv_p, bconv_p, whead_p, bhead_p)
    return out


# --------------------------------------------------------------------------
# RoI max-pooling Pallas kernel (torchvision RoIPool semantics, output 7x7).
# Scalar-prefetched per-RoI batch index + flattened 1D bin tables; the
# feature-map block of the RoI's image is selected data-dependently via the
# BlockSpec index_map.  Single pass over the H rows of the VMEM block: each
# row is loaded once and folded into 7 per-h-bin column-max accumulators with
# selects, then 49 small masked maxes over W produce the bins, each written
# directly to its output row.
# --------------------------------------------------------------------------
def _roi_pool_kernel(bidx_ref, hs_ref, he_ref, ws_ref, we_ref,
                     fm_ref, out_ref, *, H, W, pooled):
    del bidx_ref  # consumed by the index_map
    p = pl.program_id(1)
    Cb = fm_ref.shape[-1]
    dtype = fm_ref.dtype
    neg = jnp.asarray(-jnp.inf, dtype)
    ninf = jnp.full((W, Cb), neg, dtype)
    w_idx = lax.broadcasted_iota(jnp.int32, (W, 1), 0)

    hs = [hs_ref[p * pooled + ph] for ph in range(pooled)]
    he = [he_ref[p * pooled + ph] for ph in range(pooled)]
    ws = [ws_ref[p * pooled + pw] for pw in range(pooled)]
    we = [we_ref[p * pooled + pw] for pw in range(pooled)]

    # One pass over H rows: each (W, Cb) row is read from VMEM once.
    col_max = [ninf] * pooled
    for h in range(H):
        row = fm_ref[h]                                        # (W, Cb)
        for ph in range(pooled):
            in_bin = jnp.logical_and(h >= hs[ph], h < he[ph])
            col_max[ph] = jnp.where(in_bin,
                                    jnp.maximum(col_max[ph], row),
                                    col_max[ph])

    for ph in range(pooled):
        h_empty = he[ph] <= hs[ph]
        for pw in range(pooled):
            wmask = (w_idx >= ws[pw]) & (w_idx < we[pw])
            bin_max = jnp.max(jnp.where(wmask, col_max[ph], neg),
                              axis=0, keepdims=True)           # (1, Cb)
            empty = jnp.logical_or(h_empty, we[pw] <= ws[pw])
            val = jnp.where(empty, jnp.zeros_like(bin_max), bin_max)
            idx = ph * pooled + pw
            out_ref[idx:idx + 1, :] = val.astype(out_ref.dtype)


def roi_pool(feature_maps_nhwc, rois, pooled=7, spatial_scale=1.0 / 16):
    """rois: (P, 5) float (batch_idx, x1, y1, x2, y2) in image coordinates.
    RoIs should be grouped by batch index so the resident fm block is reused."""
    N, Hf, Wf, C = feature_maps_nhwc.shape
    P = rois.shape[0]
    batch_idx = rois[:, 0].astype(jnp.int32)
    x1 = jnp.round(rois[:, 1] * spatial_scale).astype(jnp.int32)
    y1 = jnp.round(rois[:, 2] * spatial_scale).astype(jnp.int32)
    x2 = jnp.round(rois[:, 3] * spatial_scale).astype(jnp.int32)
    y2 = jnp.round(rois[:, 4] * spatial_scale).astype(jnp.int32)
    roi_w = jnp.maximum(x2 - x1 + 1, 1).astype(jnp.float32)
    roi_h = jnp.maximum(y2 - y1 + 1, 1).astype(jnp.float32)
    bin_h = roi_h / pooled
    bin_w = roi_w / pooled
    pidx = jnp.arange(pooled, dtype=jnp.float32)
    hstart = jnp.floor(pidx[None, :] * bin_h[:, None]).astype(jnp.int32) + y1[:, None]
    hend = jnp.ceil((pidx[None, :] + 1.0) * bin_h[:, None]).astype(jnp.int32) + y1[:, None]
    wstart = jnp.floor(pidx[None, :] * bin_w[:, None]).astype(jnp.int32) + x1[:, None]
    wend = jnp.ceil((pidx[None, :] + 1.0) * bin_w[:, None]).astype(jnp.int32) + x1[:, None]
    # Flatten to 1D so the SMEM scalar-prefetch tables pad minimally.
    hstart = jnp.clip(hstart, 0, Hf).reshape(-1)
    hend = jnp.clip(hend, 0, Hf).reshape(-1)
    wstart = jnp.clip(wstart, 0, Wf).reshape(-1)
    wend = jnp.clip(wend, 0, Wf).reshape(-1)

    # Channel tiling keeps the double-buffered fm block small (v7x: 64 MiB VMEM).
    if C % 128 == 0:
        cblk = _largest_divisor_tile(C, 128, 512)
    else:
        # TODO(synk): pad C to a 128 multiple if large non-aligned C ever occurs.
        cblk = C
    n_cblk = C // cblk

    out = pl.pallas_call(
        functools.partial(_roi_pool_kernel, H=Hf, W=Wf, pooled=pooled),
        out_shape=jax.ShapeDtypeStruct((P, pooled * pooled, C),
                                       feature_maps_nhwc.dtype),
        grid_spec=pltpu.PrefetchScalarGridSpec(
            num_scalar_prefetch=5,
            # RoI axis innermost: consecutive RoIs of the same image hit the
            # same fm block index -> no re-DMA of the feature map.
            grid=(n_cblk, P),
            in_specs=[pl.BlockSpec(
                (None, Hf, Wf, cblk),
                lambda c, p, bidx, hs, he, ws, we: (bidx[p], 0, 0, c))],
            out_specs=pl.BlockSpec(
                (None, pooled * pooled, cblk),
                lambda c, p, bidx, hs, he, ws, we: (p, 0, c)),
        ),
        compiler_params=pltpu.CompilerParams(
            dimension_semantics=("parallel", "arbitrary")),
    )(batch_idx, hstart, hend, wstart, wend, feature_maps_nhwc)
    # (P, 49, C) -> (P, 7, 7, C) (lane-dense layout; RCNN FC weights match it)
    return out.reshape(P, pooled, pooled, C)


# --------------------------------------------------------------------------
# NMS (greedy, torchvision semantics) + the padding logic of forward_nms.
# Data-dependent control flow -> vmapped JAX glue with a pre-NMS top-k cap.
# --------------------------------------------------------------------------
def _nms_keep_mask_sorted(boxes_sorted, iou_threshold):
    x1, y1, x2, y2 = (boxes_sorted[:, 0], boxes_sorted[:, 1],
                      boxes_sorted[:, 2], boxes_sorted[:, 3])
    areas = (x2 - x1) * (y2 - y1)
    xx1 = jnp.maximum(x1[:, None], x1[None, :])
    yy1 = jnp.maximum(y1[:, None], y1[None, :])
    xx2 = jnp.minimum(x2[:, None], x2[None, :])
    yy2 = jnp.minimum(y2[:, None], y2[None, :])
    inter = jnp.maximum(xx2 - xx1, 0.0) * jnp.maximum(yy2 - yy1, 0.0)
    union = areas[:, None] + areas[None, :] - inter
    iou = inter / jnp.maximum(union, 1e-12)
    A = boxes_sorted.shape[0]
    idx = jnp.arange(A)

    def body(i, keep):
        suppress = (iou[i] > iou_threshold) & (idx > i) & keep[i]
        return keep & jnp.logical_not(suppress)

    return lax.fori_loop(0, A, body, jnp.ones((A,), dtype=bool))


def _nms_single(boxes, logits, *, n_proposals, topk):
    """boxes: (A, 4) as (y1,x1,y2,x2); logits: (A,).  Matches the reference:
    kept boxes (score order) first, then padded with the globally
    highest-scored boxes from the sorted list."""
    A = boxes.shape[0]
    k_pre = min(topk, A)                    # exact when A <= topk
    scores = jax.nn.sigmoid(logits)
    order = jnp.argsort(-scores)
    top_idx = order[:k_pre]
    boxes_sorted = boxes[top_idx]
    logits_sorted = logits[top_idx]
    keep = _nms_keep_mask_sorted(boxes_sorted[:, jnp.array([1, 0, 3, 2])], 0.7)
    kcount = jnp.sum(keep.astype(jnp.int32))
    kept_first = jnp.argsort(
        jnp.where(keep, jnp.arange(k_pre), k_pre + jnp.arange(k_pre)))
    n_from_keep = jnp.minimum(kcount, n_proposals)
    slot = jnp.arange(n_proposals)
    idx = jnp.where(slot < n_from_keep, kept_first[slot], slot - n_from_keep)
    return boxes_sorted[idx], logits_sorted[idx]


def forward_nms(rpn_reg_absolute, rpn_cls, n_proposals, pre_nms_topk=2048):
    fn = functools.partial(_nms_single, n_proposals=n_proposals,
                           topk=pre_nms_topk)
    return jax.vmap(fn)(rpn_reg_absolute, rpn_cls)


# --------------------------------------------------------------------------
# Anchor generator: anchors in (y1, x1, y2, x2), ordered (h, w, anchor).
# --------------------------------------------------------------------------
def generate_anchors(img_shape_nchw, fm_shape_nhwc, anchor_boxes):
    _, _, H_img, W_img = img_shape_nchw
    _, Hf, Wf, _ = fm_shape_nhwc
    stride_h = H_img / Hf
    stride_w = W_img / Wf
    cy = (jnp.arange(Hf, dtype=jnp.float32) + 0.5) * stride_h
    cx = (jnp.arange(Wf, dtype=jnp.float32) + 0.5) * stride_w
    ab = jnp.asarray(anchor_boxes, jnp.float32)  # (K, 2) = (h, w)
    cy_g = cy[:, None, None]
    cx_g = cx[None, :, None]
    bh = ab[None, None, :, 0]
    bw = ab[None, None, :, 1]
    y1 = cy_g - bh / 2.0
    x1 = cx_g - bw / 2.0
    y2 = cy_g + bh / 2.0
    x2 = cx_g + bw / 2.0
    anchors = jnp.stack(
        [jnp.broadcast_to(a, (Hf, Wf, ab.shape[0])) for a in (y1, x1, y2, x2)],
        axis=-1)
    return anchors.reshape(-1, 4)


# --------------------------------------------------------------------------
# Deterministic synthetic parameters.
# --------------------------------------------------------------------------
def init_params(key, fm_channels, num_anchors, num_classes,
                rcnn_hidden=256, patch=16, pooled=7):
    ks = jax.random.split(key, 8)

    def w(k, shape, fan_in):
        return jax.random.normal(k, shape, jnp.float32) / jnp.sqrt(float(fan_in))

    return {
        "cnn_w": w(ks[0], (patch * patch * 3, fm_channels), patch * patch * 3),
        "cnn_b": jnp.zeros((fm_channels,), jnp.float32),
        "rpn_conv_w": w(ks[1], (9 * fm_channels, fm_channels), 9 * fm_channels),
        "rpn_conv_b": jnp.zeros((fm_channels,), jnp.float32),
        "rpn_reg_w": w(ks[2], (fm_channels, num_anchors * 4), fm_channels),
        "rpn_reg_b": jnp.zeros((num_anchors * 4,), jnp.float32),
        "rpn_cls_w": w(ks[3], (fm_channels, num_anchors), fm_channels),
        "rpn_cls_b": jnp.zeros((num_anchors,), jnp.float32),
        # FC weight expects the (P, 7, 7, C) flattening order of roi_pool().
        "rcnn_fc_w": w(ks[4], (pooled * pooled * fm_channels, rcnn_hidden),
                       pooled * pooled * fm_channels),
        "rcnn_fc_b": jnp.zeros((rcnn_hidden,), jnp.float32),
        "rcnn_reg_w": w(ks[5], (rcnn_hidden, 4), rcnn_hidden),
        "rcnn_reg_b": jnp.zeros((4,), jnp.float32),
        "rcnn_cls_w": w(ks[6], (rcnn_hidden, num_classes), rcnn_hidden),
        "rcnn_cls_b": jnp.zeros((num_classes,), jnp.float32),
    }


# --------------------------------------------------------------------------
# Full FasterRCNN forward.
# --------------------------------------------------------------------------
def faster_rcnn_forward(params, img_nchw, anchor_boxes, n_proposals,
                        patch=16, pooled=7):
    reduction = 1.0 / 16
    N, _, H_img, W_img = img_nchw.shape
    num_anchors = len(anchor_boxes)

    # ---- backbone CNN: strided (kernel=stride=16) conv + ReLU, as a matmul ----
    img = jnp.transpose(img_nchw, (0, 2, 3, 1)).astype(jnp.bfloat16)  # NHWC
    Hf, Wf = H_img // patch, W_img // patch
    patches = img.reshape(N, Hf, patch, Wf, patch, 3).transpose(0, 1, 3, 2, 4, 5)
    patches = patches.reshape(N * Hf * Wf, patch * patch * 3)
    fm = matmul_bias(patches, params["cnn_w"], params["cnn_b"],
                     relu=True, out_dtype=jnp.bfloat16)
    C = fm.shape[-1]
    feature_maps = fm.reshape(N, Hf, Wf, C)          # bf16, NHWC

    # ---- anchors ----
    anchors = generate_anchors(img_nchw.shape, feature_maps.shape, anchor_boxes)
    A = anchors.shape[0]

    # ---- RPN: fused 3x3 conv + ReLU + reg|cls heads (no im2col, no hidden) ----
    Cout = params["rpn_conv_b"].shape[0]
    wconv = params["rpn_conv_w"].reshape(9, C, Cout)
    w_rpn_heads = jnp.concatenate([params["rpn_reg_w"], params["rpn_cls_w"]], axis=1)
    b_rpn_heads = jnp.concatenate([params["rpn_reg_b"], params["rpn_cls_b"]], axis=0)
    rpn_out = rpn_conv_heads(feature_maps, wconv, params["rpn_conv_b"],
                             w_rpn_heads, b_rpn_heads)          # (N, Hf*Wf, 128)
    rpn_reg = rpn_out[:, :, :num_anchors * 4].reshape(N, A, 4)  # .view(batch, -1, 4)
    rpn_cls = rpn_out[:, :, num_anchors * 4:num_anchors * 5].reshape(N, A)
    rpn_reg_absolute = rpn_reg + anchors[None]

    # ---- NMS + padding ----
    nms_reg, nms_cls = forward_nms(rpn_reg_absolute, rpn_cls, n_proposals)

    # ---- image ids + roi coordinate rounding (forward_roi_pooling glue) ----
    img_ids = jnp.broadcast_to(
        jnp.arange(N, dtype=jnp.float32)[:, None, None], (N, n_proposals, 1))
    nms_reg_img_ids = jnp.concatenate([img_ids, nms_reg], axis=2).reshape(-1, 5)
    rr = nms_reg_img_ids[:, jnp.array([0, 2, 1, 4, 3])]  # (id, x1, y1, x2, y2)
    rr = jnp.concatenate([
        rr[:, [0]],
        jnp.floor(rr[:, [1, 2]] * reduction) / reduction,
        jnp.ceil(rr[:, [3, 4]] * reduction) / reduction,
    ], axis=1)
    rois = roi_pool(feature_maps, rr, pooled=pooled, spatial_scale=reduction)

    # ---- RCNN head: flatten -> FC + ReLU -> fused reg|cls head ----
    flat = rois.reshape(rois.shape[0], -1)   # (P, 7*7*C) bf16, lane-dense layout
    h = matmul_bias(flat, params["rcnn_fc_w"], params["rcnn_fc_b"],
                    relu=True, out_dtype=jnp.bfloat16)
    w_rcnn_heads = jnp.concatenate([params["rcnn_reg_w"], params["rcnn_cls_w"]], axis=1)
    b_rcnn_heads = jnp.concatenate([params["rcnn_reg_b"], params["rcnn_cls_b"]], axis=0)
    rcnn_heads = matmul_bias(h, w_rcnn_heads, b_rcnn_heads)
    rcnn_reg = rcnn_heads[:, :4]
    rcnn_cls = rcnn_heads[:, 4:]

    return rpn_reg, rpn_cls, nms_reg, nms_cls, rcnn_reg, rcnn_cls, anchors


if __name__ == "__main__":
    num_classes = 5
    anchor_boxes = [(16.0, 16.0), (32.0, 16.0), (16.0, 32.0)]
    n_proposals = 8
    fm_channels = 128  # scaled down from 2048 // 2 for the small demo

    key = jax.random.PRNGKey(0)
    k_img, k_par = jax.random.split(key)
    img = jax.random.normal(k_img, (2, 3, 64, 64), jnp.float32)  # NCHW input
    params = init_params(k_par, fm_channels, len(anchor_boxes), num_classes)

    outs = faster_rcnn_forward(params, img, anchor_boxes, n_proposals)
    outs = jax.block_until_ready(outs)

    rpn_reg, rpn_cls, nms_reg, nms_cls, rcnn_reg, rcnn_cls, anchors = outs
    assert rpn_reg.shape == (2, 48, 4)
    assert rpn_cls.shape == (2, 48)
    assert nms_reg.shape == (2, n_proposals, 4)
    assert nms_cls.shape == (2, n_proposals)
    assert rcnn_reg.shape == (2 * n_proposals, 4)
    assert rcnn_cls.shape == (2 * n_proposals, num_classes)
    assert anchors.shape == (48, 4)
    print("KERNEL_OK")
</pallas_src>

<mosaic_0001>
module attributes {stable_mosaic.version = 11 : i64} {
  func.func @_mm_kernel_scratch(%arg0: i32, %arg1: i32, %arg2: i32, %arg3: memref<32x768xbf16, #tpu.memory_space<vmem>>, %arg4: memref<768x128xbf16, #tpu.memory_space<vmem>>, %arg5: memref<1x128xf32, #tpu.memory_space<vmem>>, %arg6: memref<32x128xbf16, #tpu.memory_space<vmem>>, %arg7: memref<32x128xf32, #tpu.memory_space<vmem>>) attributes {dimension_semantics = [#tpu.dimension_semantics<parallel>, #tpu.dimension_semantics<parallel>, #tpu.dimension_semantics<arbitrary>], iteration_bounds = array<i64: 1, 1, 1>, scalar_prefetch = 0 : i64, scratch_operands = 1 : i64, tpu.core_type = #tpu.core_type<tc>, window_params = [{transform_indices = @transform_0, window_bounds = array<i64: 32, 768>}, {transform_indices = @transform_1, window_bounds = array<i64: 768, 128>}, {transform_indices = @transform_2, window_bounds = array<i64: 1, 128>}, {transform_indices = @transform_3, window_bounds = array<i64: 32, 128>}]} {
    %c0_i32 = arith.constant 0 : i32
    %0 = arith.cmpi eq, %arg2, %c0_i32 : i32
    %1 = arith.extui %0 : i1 to i32
    %c0_i32_0 = arith.constant 0 : i32
    %2 = arith.cmpi ne, %1, %c0_i32_0 : i32
    scf.if %2 {
      %cst_10 = arith.constant 0.000000e+00 : f32
      %12 = vector.broadcast %cst_10 : f32 to vector<32x128xf32>
      %c0_11 = arith.constant 0 : index
      %c0_12 = arith.constant 0 : index
      %13 = vector.load %arg7[%c0_11, %c0_12] : memref<32x128xf32, #tpu.memory_space<vmem>>, vector<32x128xf32>
      tpu.vector_store %arg7[%c0_11, %c0_12], %12 {strides = array<i32>} : memref<32x128xf32, #tpu.memory_space<vmem>>, vector<32x128xf32>,
    } else {
    }
    %c0 = arith.constant 0 : index
    %c0_1 = arith.constant 0 : index
    %3 = vector.load %arg7[%c0, %c0_1] : memref<32x128xf32, #tpu.memory_space<vmem>>, vector<32x128xf32>
    %c0_2 = arith.constant 0 : index
    %c0_3 = arith.constant 0 : index
    %4 = vector.load %arg3[%c0_2, %c0_3] : memref<32x768xbf16, #tpu.memory_space<vmem>>, vector<32x768xbf16>
    %c0_4 = arith.constant 0 : index
    %c0_5 = arith.constant 0 : index
    %5 = vector.load %arg4[%c0_4, %c0_5] : memref<768x128xbf16, #tpu.memory_space<vmem>>, vector<768x128xbf16>
    %cst = arith.constant dense<0.000000e+00> : vector<32x128xf32>
    %6 = tpu.matmul %4, %5, %cst {dimension_numbers = #tpu.dot_dimension_numbers<[1], [0], [0], [1], [0, 0, 1, 1], [], []>} : vector<32x768xbf16>, vector<768x128xbf16>, vector<32x128xf32> -> vector<32x128xf32>
    %7 = arith.addf %3, %6 : vector<32x128xf32>
    %c0_6 = arith.constant 0 : index
    %c0_7 = arith.constant 0 : index
    %8 = vector.load %arg7[%c0_6, %c0_7] : memref<32x128xf32, #tpu.memory_space<vmem>>, vector<32x128xf32>
    tpu.vector_store %arg7[%c0_6, %c0_7], %7 {strides = array<i32>} : memref<32x128xf32, #tpu.memory_space<vmem>>, vector<32x128xf32>,
    %c0_i32_8 = arith.constant 0 : i32
    %9 = arith.cmpi eq, %arg2, %c0_i32_8 : i32
    %10 = arith.extui %9 : i1 to i32
    %c0_i32_9 = arith.constant 0 : i32
    %11 = arith.cmpi ne, %10, %c0_i32_9 : i32
    scf.if %11 {
      %c0_10 = arith.constant 0 : index
      %c0_11 = arith.constant 0 : index
      %12 = vector.load %arg7[%c0_10, %c0_11] : memref<32x128xf32, #tpu.memory_space<vmem>>, vector<32x128xf32>
      %c0_12 = arith.constant 0 : index
      %c0_13 = arith.constant 0 : index
      %13 = vector.load %arg5[%c0_12, %c0_13] : memref<1x128xf32, #tpu.memory_space<vmem>>, vector<1x128xf32>
      %14 = vector.broadcast %13 : vector<1x128xf32> to vector<32x128xf32>
      %15 = arith.addf %12, %14 : vector<32x128xf32>
      %cst_14 = arith.constant 0.000000e+00 : f32
      %16 = vector.broadcast %cst_14 : f32 to vector<32x128xf32>
      %17 = arith.maximumf %15, %16 : vector<32x128xf32>
      %18 = arith.truncf %17 : vector<32x128xf32> to vector<32x128xbf16>
      %c0_15 = arith.constant 0 : index
      %c0_16 = arith.constant 0 : index
      %19 = vector.load %arg6[%c0_15, %c0_16] : memref<32x128xbf16, #tpu.memory_space<vmem>>, vector<32x128xbf16>
      tpu.vector_store %arg6[%c0_15, %c0_16], %18 {strides = array<i32>} : memref<32x128xbf16, #tpu.memory_space<vmem>>, vector<32x128xbf16>,
    } else {
    }
    return
  }
  func.func @transform_0(%arg0: i32, %arg1: i32, %arg2: i32) -> (i32, i32) {
    %c0_i32 = arith.constant 0 : i32
    return %arg0, %arg2 : i32, i32
  }
  func.func @transform_1(%arg0: i32, %arg1: i32, %arg2: i32) -> (i32, i32) {
    %c0_i32 = arith.constant 0 : i32
    return %arg2, %arg1 : i32, i32
  }
  func.func @transform_2(%arg0: i32, %arg1: i32, %arg2: i32) -> (i32, i32) {
    %c0_i32 = arith.constant 0 : i32
    %c0_i32_0 = arith.constant 0 : i32
    return %c0_i32, %arg1 : i32, i32
  }
  func.func @transform_3(%arg0: i32, %arg1: i32, %arg2: i32) -> (i32, i32) {
    %c0_i32 = arith.constant 0 : i32
    return %arg0, %arg1 : i32, i32
  }
}

</mosaic_0001>

<bundles_post_ra>
// kernel: tpu_custom_call.1
= control target key start
LH: loop header
LB: loop body
LE: loop exit
PB: predicated region body
PF: predicated region fallthrough
CT: control target
= control target key end

     0   :  { %8 = vsyncpa [#allocation4], 0  ;;  %s1124_s0 = inlined_call_operand.hbm [shape: bf16[32,768], index: 0, kind: input, shape index: {}]   ;;  %s1125_s1 = inlined_call_operand.hbm [shape: bf16[768,128], index: 1, kind: input, shape index: {}]   ;;  %s1126_s2 = inlined_call_operand.vmem [shape: f32[1,128], index: 2, kind: input, shape index: {}]   ;;  %s1127_s3 = inlined_call_operand.hbm [shape: bf16[32,128], index: 3, kind: output, shape index: {}]  }
   0x1   :  { %9 = vsyncpa [#allocation7], 0 }
   0x2   :  { %10 = vsyncpa [#allocation5], 0  ;;  %s1052_s12 = smov [#allocation3]   ;;  %s980_s16 = scalar_lea.hbm %s1124_s0, 1536 }
   0x3   :  { %s16_s13 = sshll.u32 %s1052_s12, 4  ;;  %p981_p0 = scmp.ne.s32.totalorder %s1124_s0, %s980_s16  ;;  %s17_s13 = int_to_ptr.vmem [resolvable:$true] %s16_s13 }
   0x4   :  { %p984_p1 = scmp.lt.u32.totalorder %s980_s16, %s1124_s0 }
   0x6   :  { %p986_p2 = pnand %p984_p1, %p981_p0 }
   0x8   :  { %989 = shalt.err (!%p986_p2)
}
   0x9   :  { %s990_s21 = scalar_lea.vmem %s17_s13, 1536  ;;  %p995_p4 = scmp.lt.s32.totalorder %s17_s13, %s17_s13 }
   0xa   :  { %p991_p3 = scmp.ne.s32.totalorder %s17_s13, %s990_s21  ;;  %p996_p5 = scmp.lt.s32.totalorder %s990_s21, %s990_s21 }
   0xc   :  { %p997_p6 = por %p996_p5, %p995_p4 }
   0xe   :  { %p998_p7 = pnand %p997_p6, %p991_p3 }
  0x10   :  { %1001 = shalt.err (!%p998_p7)
}
  0x11   :  { %s1053_s22 = smov 384   ;;  %s1054_s23 = smov 24  }
  0x12   :  { %22 = dma.hbm_to_vmem [thread:$0]  %s1124_s0, 1536, %s17_s13, [#allocation4], %s1053_s22, %s1053_s22, %s1054_s23  }
  0x13   :  { %s1055_s26 = smov [#allocation6]   ;;  %s1002_s30 = scalar_lea.hbm %s1125_s1, 6144 }
  0x14   :  { %s28_s27 = sshll.u32 %s1055_s26, 4  ;;  %p1003_p8 = scmp.ne.s32.totalorder %s1125_s1, %s1002_s30  ;;  %s29_s27 = int_to_ptr.vmem [resolvable:$true] %s28_s27 }
  0x15   :  { %p1006_p9 = scmp.lt.u32.totalorder %s1002_s30, %s1125_s1 }
  0x17   :  { %p1008_p10 = pnand %p1006_p9, %p1003_p8 }
  0x19   :  { %1011 = shalt.err (!%p1008_p10)
}
  0x1a   :  { %s1012_s8 = scalar_lea.vmem %s29_s27, 6144  ;;  %p1017_p12 = scmp.lt.s32.totalorder %s29_s27, %s29_s27 }
  0x1b   :  { %p1013_p11 = scmp.ne.s32.totalorder %s29_s27, %s1012_s8  ;;  %p1018_p13 = scmp.lt.s32.totalorder %s1012_s8, %s1012_s8 }
  0x1d   :  { %p1019_p0 = por %p1018_p13, %p1017_p12 }
  0x1f   :  { %p1020_p1 = pnand %p1019_p0, %p1013_p11 }
  0x21   :  { %1023 = shalt.err (!%p1020_p1)
}
  0x22   :  { %s1056_s0 = smov 64   ;;  %s1057_s9 = smov 4  }
  0x23   :  { %34 = dma.hbm_to_vmem [thread:$0]  %s1125_s1, 6144, %s29_s27, [#allocation7], %s1056_s0, %s1056_s0, %s1057_s9  }
  0x24   :  { %1046 = dma.done.wait [#allocation4], 1536  }
  0x25   :  { %1047 = vsyncadd [#allocation4], 4294965760 }
  0x26   :  { %1048 = dma.done.wait [#allocation7], 6144  }
  0x27   :  { %1049 = vsyncadd [#allocation7], 4294961152  ;;  %v914_v0 = vld [vmem:[#allocation6 + $0x40] sm:$0xff]   ;;  %v918_v4 = vld [vmem:[#allocation6 + $0x48] sm:$0xff]   ;;  %s1058_s13 = smov [#allocation8]  }
  0x28   :  { %v915_v1 = vld [vmem:[#allocation6 + $0xc0] sm:$0xff]   ;;  %807 = vmatprep.subr.bf16.mxu0 %v914_v0  ;;  %v919_v5 = vld [vmem:[#allocation6 + $0xc8] sm:$0xff]   ;;  %v922_v8 = vld [vmem:[#allocation6 + $0x50] sm:$0xff]   ;;  %s714_s14 = sshll.u32 %s1058_s13, 4  ;;  %s715_s14 = int_to_ptr.vmem [resolvable:$true] %s714_s14 }
  0x29   :  { %v916_v2 = vld [vmem:[#allocation6] sm:$0xff]   ;;  %835 = vmatprep.subr.bf16.mxu1 %v915_v1  ;;  %v920_v6 = vld [vmem:[#allocation6 + $0x8] sm:$0xff]   ;;  %v923_v9 = vld [vmem:[#allocation6 + $0xd0] sm:$0xff]   ;;  %p1029_p3 = scmp.lt.s32.totalorder %s715_s14, %s715_s14 }
  0x2a   :  { %v917_v3 = vld [vmem:[#allocation6 + $0x80] sm:$0xff]   ;;  %808 = vmatpush3.bf16.msra.mxu0 %v916_v2  ;;  %v921_v7 = vld [vmem:[#allocation6 + $0x88] sm:$0xff]   ;;  %v924_v10 = vld [vmem:[#allocation6 + $0x10] sm:$0xff]  }
  0x2b   :  { %836 = vmatpush3.bf16.msra.mxu1 %v917_v3  ;;  %809 = vmatprep.subr.bf16.mxu0 %v918_v4  ;;  %v925_v11 = vld [vmem:[#allocation6 + $0x90] sm:$0xff]   ;;  %v926_v12 = vld [vmem:[#allocation6 + $0x58] sm:$0xff]   ;;  %v930_v16 = vld [vmem:[#allocation6 + $0x60] sm:$0xff]  }
  0x2c   :  { %837 = vmatprep.subr.bf16.mxu1 %v919_v5  ;;  %v927_v13 = vld [vmem:[#allocation6 + $0xd8] sm:$0xff]   ;;  %v931_v17 = vld [vmem:[#allocation6 + $0xe0] sm:$0xff]   ;;  %v934_v20 = vld [vmem:[#allocation6 + $0x68] sm:$0xff]  }
  0x2d   :  { %v928_v14 = vld [vmem:[#allocation6 + $0x18] sm:$0xff]   ;;  %v932_v18 = vld [vmem:[#allocation6 + $0x20] sm:$0xff]   ;;  %v935_v21 = vld [vmem:[#allocation6 + $0xe8] sm:$0xff]  }
  0x2e   :  { %810 = vmatpush3.bf16.msra.mxu0 %v920_v6  ;;  %v929_v15 = vld [vmem:[#allocation6 + $0x98] sm:$0xff]   ;;  %v933_v19 = vld [vmem:[#allocation6 + $0xa0] sm:$0xff]   ;;  %v936_v22 = vld [vmem:[#allocation6 + $0x28] sm:$0xff]  }
  0x2f   :  { %838 = vmatpush3.bf16.msra.mxu1 %v921_v7  ;;  %811 = vmatprep.subr.bf16.mxu0 %v922_v8  ;;  %v937_v23 = vld [vmem:[#allocation6 + $0xa8] sm:$0xff]   ;;  %v938_v24 = vld [vmem:[#allocation6 + $0x70] sm:$0xff]   ;;  %v942_v28 = vld [vmem:[#allocation6 + $0x78] sm:$0xff]  }
  0x30   :  { %839 = vmatprep.subr.bf16.mxu1 %v923_v9  ;;  %v939_v25 = vld [vmem:[#allocation6 + $0xf0] sm:$0xff]   ;;  %v943_v29 = vld [vmem:[#allocation6 + $0xf8] sm:$0xff]   ;;  %v949_v34 = vld [vmem:[#allocation3 + $0x8] ss:$24 sps:$4 sm:$0xff]  }
  0x31   :  { %v940_v26 = vld [vmem:[#allocation6 + $0x30] sm:$0xff]   ;;  %v944_v30 = vld [vmem:[#allocation6 + $0x38] sm:$0xff]   ;;  %v951_v35 = vld [vmem:[#allocation3 + $0xc] ss:$24 sps:$4 sm:$0xff]  }
  0x32   :  { %812 = vmatpush3.bf16.msra.mxu0 %v924_v10  ;;  %v941_v27 = vld [vmem:[#allocation6 + $0xb0] sm:$0xff]   ;;  %v945_v31 = vld [vmem:[#allocation6 + $0xb8] sm:$0xff]   ;;  %v952_v36 = vld [vmem:[#allocation6 + $0x140] sm:$0xff]   ;;  %593 = vmatprep.mubr.bf16.mxu1 %v951_v35 }
  0x33   :  { %840 = vmatpush3.bf16.msra.mxu1 %v925_v11  ;;  %813 = vmatprep.subr.bf16.mxu0 %v926_v12  ;;  %v946_v32 = vld [vmem:[#allocation3] ss:$24 sps:$4 sm:$0xff]   ;;  %v948_v33 = vld [vmem:[#allocation3 + $0x4] ss:$24 sps:$4 sm:$0xff]   ;;  %v954_v38 = vld [vmem:[#allocation6 + $0x148] sm:$0xff]  }
  0x34   :  { %841 = vmatprep.subr.bf16.mxu1 %v927_v13  ;;  %544 = vmatprep.mubr.bf16.mxu0 %v948_v33  ;;  %v953_v37 = vld [vmem:[#allocation6 + $0x100] sm:$0xff]   ;;  %v955_v39 = vld [vmem:[#allocation6 + $0x108] sm:$0xff]   ;;  %v956_v40 = vld [vmem:[#allocation6 + $0x150] sm:$0xff]  }
  0x35   :  { %v957_v41 = vld [vmem:[#allocation6 + $0x110] sm:$0xff]   ;;  %v958_v42 = vld [vmem:[#allocation6 + $0x158] sm:$0xff]   ;;  %v960_v46 = vld [vmem:[#allocation6 + $0x160] sm:$0xff]  }
  0x36   :  { %814 = vmatpush3.bf16.msra.mxu0 %v928_v14  ;;  %v959_v43 = vld [vmem:[#allocation6 + $0x118] sm:$0xff]   ;;  %v962_v44 = vld [vmem:[#allocation3 + $0x34] ss:$24 sps:$4 sm:$0xff]   ;;  %v967_v47 = vld [vmem:[#allocation3 + $0x30] ss:$24 sps:$4 sm:$0xff]  }
  0x37   :  { %842 = vmatpush3.bf16.msra.mxu1 %v929_v15  ;;  %815 = vmatprep.subr.bf16.mxu0 %v930_v16  ;;  %v964_v45 = vld [vmem:[#allocation3 + $0x3c] ss:$24 sps:$4 sm:$0xff]   ;;  %v968_v48 = vld [vmem:[#allocation3 + $0x38] ss:$24 sps:$4 sm:$0xff]   ;;  %v961_v49 = vld [vmem:[#allocation6 + $0x120] sm:$0xff]  }
  0x38   :  { %843 = vmatprep.subr.bf16.mxu1 %v931_v17  ;;  %v966_v50 = vld [vmem:[#allocation6 + $0x168] sm:$0xff]   ;;  %v970_v53 = vld [vmem:[#allocation6 + $0x170] sm:$0xff]   ;;  %v979_v54 = vld [vmem:[#allocation3 + $0x44] ss:$24 sps:$4 sm:$0xff]  }
  0x39   :  { %v969_v51 = vld [vmem:[#allocation6 + $0x128] sm:$0xff]   ;;  %v971_v55 = vld [vmem:[#allocation6 + $0x130] sm:$0xff]   ;;  %v972_v56 = vld [vmem:[#allocation6 + $0x178] sm:$0xff]  }
  0x3a   :  { %816 = vmatpush3.bf16.msra.mxu0 %v932_v18  ;;  %v976_v52 = vld [vmem:[#allocation3 + $0x14] ss:$24 sps:$4 sm:$0xff]   ;;  %v973_v57 = vld [vmem:[#allocation6 + $0x138] sm:$0xff]   ;;  %v974_v58 = vld [vmem:[#allocation3 + $0x10] ss:$24 sps:$4 sm:$0xff]  }
  0x3b   :  { %844 = vmatpush3.bf16.msra.mxu1 %v933_v19  ;;  %817 = vmatprep.subr.bf16.mxu0 %v934_v20  ;;  %v977_v59 = vld [vmem:[#allocation3 + $0x40] ss:$24 sps:$4 sm:$0xff]  }
  0x3c   :  { %845 = vmatprep.subr.bf16.mxu1 %v935_v21 }
  0x3e   :  { %818 = vmatpush3.bf16.msra.mxu0 %v936_v22 }
  0x3f   :  { %846 = vmatpush3.bf16.msra.mxu1 %v937_v23  ;;  %819 = vmatprep.subr.bf16.mxu0 %v938_v24 }
  0x40   :  { %847 = vmatprep.subr.bf16.mxu1 %v939_v25 }
  0x42   :  { %820 = vmatpush3.bf16.msra.mxu0 %v940_v26 }
  0x43   :  { %848 = vmatpush3.bf16.msra.mxu1 %v941_v27  ;;  %821 = vmatprep.subr.bf16.mxu0 %v942_v28 }
  0x44   :  { %849 = vmatprep.subr.bf16.mxu1 %v943_v29 }
  0x46   :  { %822 = vmatpush3.bf16.msra.mxu0 %v944_v30  ;;  %v787_v30 = vld [vmem:[%s1126_s2] ss:$0 sm:$0xff]  ;;  %s1024_s2 = scalar_lea.vmem %s715_s14, 256 }
  0x47   :  { %850 = vmatpush3.bf16.msra.mxu1 %v945_v31  ;;  %863 = vmatprep.subr.bf16.mxu0 %v952_v36  ;;  %p1025_p2 = scmp.ne.s32.totalorder %s715_s14, %s1024_s2  ;;  %p1030_p4 = scmp.lt.s32.totalorder %s1024_s2, %s1024_s2 }
  0x48   :  { %891 = vmatprep.subr.bf16.mxu1 %v952_v36 }
  0x49   :  { %545 = vmatmul.mubr.bf16.vlgmr.msra.gmra.mrb[0].mxu0 %v946_v32  ;;  %p1031_p5 = por %p1030_p4, %p1029_p3 }
  0x4a   :  { %594 = vmatmul.mubr.bf16.vlgmr.msra.gmra.mrb[0].mxu1 %v949_v34  ;;  %864 = vmatpush3.bf16.msra.mxu0 %v953_v37 }
  0x4b   :  { %899 = vmatpush3.bf16.msra.mxu1 %v953_v37  ;;  %865 = vmatprep.subr.bf16.mxu0 %v954_v38  ;;  %p1032_p6 = pnand %p1031_p5, %p1025_p2 }
  0x4c   :  { %892 = vmatprep.subr.bf16.mxu1 %v954_v38  ;;  %552 = vmatprep.mubr.bf16.mxu0 %v962_v44 }
  0x4d   :  { %601 = vmatprep.mubr.bf16.mxu1 %v964_v45 }
  0x4e   :  { %866 = vmatpush3.bf16.msra.mxu0 %v955_v39 }
  0x4f   :  { %900 = vmatpush3.bf16.msra.mxu1 %v955_v39  ;;  %867 = vmatprep.subr.bf16.mxu0 %v956_v40 }
  0x50   :  { %893 = vmatprep.subr.bf16.mxu1 %v956_v40 }
  0x51   :  { %553 = vmatmul.mubr.bf16.gmra.mrb[4].mxu0 %v967_v47 }
  0x52   :  { %868 = vmatpush3.bf16.msra.mxu0 %v957_v41  ;;  %602 = vmatmul.mubr.bf16.gmra.mrb[4].mxu1 %v968_v48 }
  0x53   :  { %901 = vmatpush3.bf16.msra.mxu1 %v957_v41  ;;  %869 = vmatprep.subr.bf16.mxu0 %v958_v42 }
  0x54   :  { %894 = vmatprep.subr.bf16.mxu1 %v958_v42  ;;  %642 = vmatprep.mubr.bf16.mxu0 %v976_v52 }
  0x55   :  { %650 = vmatprep.mubr.bf16.mxu1 %v979_v54 }
  0x56   :  { %870 = vmatpush3.bf16.msra.mxu0 %v959_v43 }
  0x57   :  { %902 = vmatpush3.bf16.msra.mxu1 %v959_v43  ;;  %871 = vmatprep.subr.bf16.mxu0 %v960_v46 }
  0x58   :  { %895 = vmatprep.subr.bf16.mxu1 %v960_v46 }
  0x5a   :  { %872 = vmatpush3.bf16.msra.mxu0 %v961_v49 }
  0x5b   :  { %903 = vmatpush3.bf16.msra.mxu1 %v961_v49  ;;  %873 = vmatprep.subr.bf16.mxu0 %v966_v50 }
  0x5c   :  { %896 = vmatprep.subr.bf16.mxu1 %v966_v50 }
  0x5e   :  { %874 = vmatpush3.bf16.msra.mxu0 %v969_v51 }
  0x5f   :  { %904 = vmatpush3.bf16.msra.mxu1 %v969_v51  ;;  %875 = vmatprep.subr.bf16.mxu0 %v970_v53 }
  0x60   :  { %897 = vmatprep.subr.bf16.mxu1 %v970_v53 }
  0x62   :  { %876 = vmatpush3.bf16.msra.mxu0 %v971_v55 }
  0x63   :  { %905 = vmatpush3.bf16.msra.mxu1 %v971_v55  ;;  %877 = vmatprep.subr.bf16.mxu0 %v972_v56 }
  0x64   :  { %898 = vmatprep.subr.bf16.mxu1 %v972_v56 }
  0x66   :  { %878 = vmatpush3.bf16.msra.mxu0 %v973_v57 }
  0x67   :  { %906 = vmatpush3.bf16.msra.mxu1 %v973_v57 }
  0x69   :  { %643 = vmatmul.mubr.bf16.vlgmr.msra.gmra.mrb[8].mxu0 %v974_v58 }
  0x6a   :  { %651 = vmatmul.mubr.bf16.vlgmr.msra.gmra.mrb[8].mxu1 %v977_v59 }
 0x11c   :  { %v823_v60 = vpop.f32.mrb[0].mxu0 }
 0x11d   :  { %v851_v61 = vpop.f32.mrb[0].mxu1  ;;  %v824_v62 = vpop.f32.mrb[1].mxu0 }
 0x11e   :  { %v825_v63 = vadd.f32 %v824_v62, %v823_v60  ;;  %v852_v0 = vpop.f32.mrb[1].mxu1  ;;  %v826_v1 = vpop.f32.mrb[2].mxu0 }
 0x11f   :  { %v853_v2 = vadd.f32 %v852_v0, %v851_v61  ;;  %v854_v3 = vpop.f32.mrb[2].mxu1  ;;  %v827_v4 = vpop.f32.mrb[3].mxu0 }
 0x120   :  { %v828_v5 = vadd.f32 %v827_v4, %v826_v1  ;;  %v855_v6 = vpop.f32.mrb[3].mxu1 }
 0x121   :  { %v596_v7 = vadd.f32 %v853_v2, %v825_v63  ;;  %v856_v8 = vadd.f32 %v855_v6, %v854_v3 }
 0x123   :  { %v599_v9 = vadd.f32 %v856_v8, %v828_v5 }
 0x124   :  { %v829_v10 = vpop.f32.mrb[4].mxu0 }
 0x125   :  { %v857_v11 = vpop.f32.mrb[4].mxu1  ;;  %v830_v12 = vpop.f32.mrb[5].mxu0 }
 0x126   :  { %v831_v13 = vadd.f32 %v830_v12, %v829_v10  ;;  %v858_v14 = vpop.f32.mrb[5].mxu1  ;;  %v832_v15 = vpop.f32.mrb[6].mxu0 }
 0x127   :  { %v859_v16 = vadd.f32 %v858_v14, %v857_v11  ;;  %v860_v17 = vpop.f32.mrb[6].mxu1  ;;  %v833_v18 = vpop.f32.mrb[7].mxu0 }
 0x128   :  { %v834_v19 = vadd.f32 %v833_v18, %v832_v15  ;;  %v861_v20 = vpop.f32.mrb[7].mxu1 }
 0x129   :  { %v604_v21 = vadd.f32 %v859_v16, %v831_v13  ;;  %v862_v22 = vadd.f32 %v861_v20, %v860_v17 }
 0x12b   :  { %v607_v23 = vadd.f32 %v862_v22, %v834_v19 }
 0x13c   :  { %v879_v24 = vpop.f32.mrb[8].mxu0 }
 0x13d   :  { %v885_v25 = vpop.f32.mrb[8].mxu1  ;;  %v880_v26 = vpop.f32.mrb[9].mxu0 }
 0x13e   :  { %v881_v27 = vadd.f32 %v880_v26, %v879_v24  ;;  %v886_v28 = vpop.f32.mrb[9].mxu1  ;;  %v882_v29 = vpop.f32.mrb[10].mxu0 }
 0x13f   :  { %v887_v31 = vadd.f32 %v886_v28, %v885_v25  ;;  %v888_v32 = vpop.f32.mrb[10].mxu1  ;;  %v883_v33 = vpop.f32.mrb[11].mxu0 }
 0x140   :  { %v645_v34 = vadd.f32 %v881_v27, %v596_v7  ;;  %v884_v35 = vadd.f32 %v883_v33, %v882_v29  ;;  %v889_v36 = vpop.f32.mrb[11].mxu1 }
 0x141   :  { %v653_v37 = vadd.f32 %v887_v31, %v604_v21  ;;  %v890_v38 = vadd.f32 %v889_v36, %v888_v32 }
 0x142   :  { %v681_v39 = vadd.f32 %v787_v30, %v645_v34  ;;  %v648_v40 = vadd.f32 %v884_v35, %v599_v9 }
 0x143   :  { %v683_v41 = vadd.f32 %v787_v30, %v653_v37  ;;  %v656_v42 = vadd.f32 %v890_v38, %v607_v23 }
 0x144   :  { %v682_v43 = vadd.f32 %v787_v30, %v648_v40  ;;  %v685_v45 = vmax.f32 %v681_v39, 0.0 }
 0x145   :  { %v684_v44 = vadd.f32 %v787_v30, %v656_v42  ;;  %v687_v47 = vmax.f32 %v683_v41, 0.0 }
 0x146   :  { %v686_v46 = vmax.f32 %v682_v43, 0.0 }
 0x147   :  { %v688_v48 = vmax.f32 %v684_v44, 0.0 }
 0x148   :  { %v799_v49 = vpack.c.bf16 %v686_v46, %v685_v45 }
 0x149   :  { %v804_v50 = vpack.c.bf16 %v688_v48, %v687_v47 }
 0x14a   :  { %800 = vst [vmem:[#allocation8] sm:$0xff] %v799_v49  }
 0x14b   :  { %806 = vst [vmem:[#allocation8 + $0x8] sm:$0xff] %v804_v50  }
 0x14c   :  { %1035 = shalt.err (!%p1032_p6)
}
 0x14d   :  { %s1036_s17 = scalar_lea.hbm %s1127_s3, 256 }
 0x14e   :  { %p1037_p7 = scmp.ne.s32.totalorder %s1127_s3, %s1036_s17  ;;  %p1040_p8 = scmp.lt.u32.totalorder %s1036_s17, %s1127_s3 }
 0x150   :  { %p1042_p9 = pnand %p1040_p8, %p1037_p7 }
 0x152   :  { %1045 = shalt.err (!%p1042_p9)
}
 0x153   :  { %720 = dma.vmem_to_hbm [thread:$0]  %s715_s14, 256, %s1127_s3, [#allocation5], %s1056_s0, %s1056_s0, %s1057_s9  }
 0x154   :  { %1050 = dma.done.wait [#allocation5], 256  }
 0x155   :  { %1051 = vsyncadd [#allocation5], 4294967040 }
 0x156   :  { %724 = vsyncpa [#allocation4], 1 }
 0x157   :  { %725 = vsyncpa [#allocation7], 1 }
 0x158   :  { %726 = vsyncpa [#allocation5], 1 }

</bundles_post_ra>
